<compile_context>
chip_gen: v6e
topology: v6e:2x2x1
jax: 0.10.0
libtpu: 0.0.40
codegen_flags: <defaults>
</compile_context>

<pallas_src>
import functools

import jax
import jax.numpy as jnp
from jax.experimental import pallas as pl
from jax.experimental.pallas import tpu as pltpu


def _outconv_kernel(x_ref, w_ref, b_ref, o_ref):
    # x_ref: (NB, C_in, TS)   w_ref: (C_out, C_in)   b_ref: (C_out, 1)
    # o_ref: (NB, C_out, TS)
    #
    # NOTE: padded lanes of a partial edge spatial block (and padded rows of a
    # partial batch block) flow through the matmul + sigmoid and are masked on
    # write-back.  That is safe because the contraction is over channels only
    # -- do NOT add any cross-lane / cross-batch reduction here.
    w = w_ref[...]
    b = b_ref[...]
    nb = x_ref.shape[0]

    def _one(i):
        # Small-K matmul; no explicit up-casts -- preferred_element_type keeps
        # the accumulation in f32 (native MXU path for bf16 inputs).
        z = jnp.dot(w, x_ref[i], preferred_element_type=jnp.float32)
        z = z + b
        o_ref[i] = jax.nn.sigmoid(z).astype(o_ref.dtype)

    if nb == 1:
        _one(0)
    else:
        def body(i, carry):
            _one(i)
            return carry

        jax.lax.fori_loop(0, nb, body, 0)


@functools.partial(jax.jit, static_argnames=("vmem_budget_bytes",))
def outconv_forward(x_nchw, weight, bias, vmem_budget_bytes=12 * 1024 * 1024):
    """1x1 conv + sigmoid, matching nn.Conv2d(C_in, C_out, 1) -> Sigmoid.

    x_nchw : (N, C_in, H, W)
    weight : (C_out, C_in) or (C_out, C_in, 1, 1)
    bias   : (C_out,)
    returns: (N, C_out, H, W)
    """
    N, C_in, H, W = x_nchw.shape
    if weight.ndim == 4:  # PyTorch conv weight (C_out, C_in, 1, 1)
        weight = weight.reshape(weight.shape[0], weight.shape[1])
    C_out = weight.shape[0]
    HW = H * W

    x3 = x_nchw.reshape(N, C_in, HW)  # free reshape: NCHW is already spatial-last
    # NOTE: weights/bias are cast to the activation dtype.  For bf16
    # activations this follows the usual bf16-inference convention but
    # diverges slightly from PyTorch's f32-weight accumulation.
    w = weight.reshape(C_out, C_in).astype(x3.dtype)
    b = bias.reshape(C_out, 1).astype(x3.dtype)

    dtype_bytes = jnp.dtype(x3.dtype).itemsize
    # Bytes per spatial lane of one double-buffered (input + output) pipeline step.
    per_lane = 2 * (C_in + C_out) * dtype_bytes
    budget_lanes = max(128, vmem_budget_bytes // per_lane)

    if HW > 128 and budget_lanes < HW:
        # Large images: tile the spatial (lane) axis, one batch item per step.
        nb = 1
        ts = max(128, (min(budget_lanes, HW) // 128) * 128)
    else:
        # Small images: whole image per step; block batch items to amortize
        # the ~0.35us per-grid-step overhead.
        ts = HW
        nb = int(max(1, min(N, budget_lanes // max(HW, 1))))
        if nb >= N and N > 1:
            # Keep at least 2 grid steps so both TensorCores get work.
            nb = (N + 1) // 2

    grid = (pl.cdiv(N, nb), pl.cdiv(HW, ts))

    cost = pl.CostEstimate(
        flops=2 * N * C_out * C_in * HW,
        transcendentals=N * C_out * HW,
        bytes_accessed=(N * (C_in + C_out) * HW + C_out * C_in + C_out) * dtype_bytes,
    )

    out3 = pl.pallas_call(
        _outconv_kernel,
        out_shape=jax.ShapeDtypeStruct((N, C_out, HW), x3.dtype),
        grid_spec=pltpu.PrefetchScalarGridSpec(
            num_scalar_prefetch=0,
            grid=grid,
            in_specs=[
                # (nb, C_in, ts) block: lane-dense spatial tile (or the full
                # spatial axis), nb batch items per step.
                pl.BlockSpec((nb, C_in, ts), lambda n, s: (n, 0, s)),
                # weight & bias: constant block index -> DMA'd once, resident.
                pl.BlockSpec((C_out, C_in), lambda n, s: (0, 0)),
                pl.BlockSpec((C_out, 1), lambda n, s: (0, 0)),
            ],
            out_specs=pl.BlockSpec((nb, C_out, ts), lambda n, s: (n, 0, s)),
        ),
        compiler_params=pltpu.CompilerParams(
            dimension_semantics=("parallel", "parallel"),
            vmem_limit_bytes=32 * 1024 * 1024,
        ),
        cost_estimate=cost,
    )(x3, w, b)

    return out3.reshape(N, C_out, H, W)


def _reference(x_nchw, weight, bias):
    # Pure-JAX reference: 1x1 conv == einsum over the channel dim.
    z = jnp.einsum("nchw,oc->nohw", x_nchw, weight) + bias[None, :, None, None]
    return jax.nn.sigmoid(z)


if __name__ == "__main__":
    key = jax.random.PRNGKey(0)
    k_x, k_w, k_b = jax.random.split(key, 3)

    N, C_in, C_out, H, W = 2, 4, 3, 16, 16

    x = jax.random.normal(k_x, (N, C_in, H, W), dtype=jnp.float32)
    # Deterministic "Conv2d(in, out, kernel_size=1)" params.
    bound = 1.0 / jnp.sqrt(jnp.float32(C_in))
    weight = jax.random.uniform(k_w, (C_out, C_in), jnp.float32, -bound, bound)
    bias = jax.random.uniform(k_b, (C_out,), jnp.float32, -bound, bound)

    y = outconv_forward(x, weight, bias)
    jax.block_until_ready(y)
    y_ref = _reference(x, weight, bias)
    assert y.shape == (N, C_out, H, W), y.shape
    assert jnp.allclose(y, y_ref, atol=1e-5, rtol=1e-5), float(jnp.max(jnp.abs(y - y_ref)))

    # Exercise the batch-blocked path (nb > 1) at a small shape by shrinking
    # the VMEM budget.
    x2 = jax.random.normal(k_x, (4, C_in, 16, 16), dtype=jnp.float32)
    y2 = outconv_forward(x2, weight, bias, vmem_budget_bytes=64 * 1024)
    jax.block_until_ready(y2)
    assert jnp.allclose(y2, _reference(x2, weight, bias), atol=1e-5, rtol=1e-5)

    # Exercise the spatial-tiling path (ts < HW, masked partial edge block).
    x3t = jax.random.normal(k_x, (1, C_in, 16, 20), dtype=jnp.float32)
    y3 = outconv_forward(x3t, weight, bias, vmem_budget_bytes=56 * 128)
    jax.block_until_ready(y3)
    assert jnp.allclose(y3, _reference(x3t, weight, bias), atol=1e-5, rtol=1e-5)

    print("KERNEL_OK")
</pallas_src>

<mosaic_0001>
module attributes {stable_mosaic.version = 11 : i64} {
  func.func @_outconv_kernel(%arg0: i32, %arg1: i32, %arg2: memref<1x4x256xf32, #tpu.memory_space<vmem>>, %arg3: memref<3x4xf32, #tpu.memory_space<vmem>>, %arg4: memref<3x1xf32, #tpu.memory_space<vmem>>, %arg5: memref<1x3x256xf32, #tpu.memory_space<vmem>>) attributes {dimension_semantics = [#tpu.dimension_semantics<parallel>, #tpu.dimension_semantics<parallel>], iteration_bounds = array<i64: 2, 1>, scalar_prefetch = 0 : i64, scratch_operands = 0 : i64, tpu.core_type = #tpu.core_type<tc>, window_params = [{transform_indices = @transform_0, window_bounds = array<i64: 1, 4, 256>}, {pipeline_mode = #tpu.pipeline_mode<synchronous>, transform_indices = @transform_1, window_bounds = array<i64: 3, 4>}, {pipeline_mode = #tpu.pipeline_mode<synchronous>, transform_indices = @transform_2, window_bounds = array<i64: 3, 1>}, {transform_indices = @transform_3, window_bounds = array<i64: 1, 3, 256>}]} {
    %c0 = arith.constant 0 : index
    %c0_0 = arith.constant 0 : index
    %0 = vector.load %arg3[%c0, %c0_0] : memref<3x4xf32, #tpu.memory_space<vmem>>, vector<3x4xf32>
    %c0_1 = arith.constant 0 : index
    %c0_2 = arith.constant 0 : index
    %1 = vector.load %arg4[%c0_1, %c0_2] : memref<3x1xf32, #tpu.memory_space<vmem>>, vector<3x1xf32>
    %c0_3 = arith.constant 0 : index
    %c0_4 = arith.constant 0 : index
    %c0_5 = arith.constant 0 : index
    %2 = vector.load %arg2[%c0_3, %c0_4, %c0_5] : memref<1x4x256xf32, #tpu.memory_space<vmem>>, vector<1x4x256xf32>
    %3 = vector.shape_cast %2 : vector<1x4x256xf32> to vector<4x256xf32>
    %cst = arith.constant dense<0.000000e+00> : vector<3x256xf32>
    %4 = tpu.matmul %0, %3, %cst {dimension_numbers = #tpu.dot_dimension_numbers<[1], [0], [0], [1], [0, 0, 1, 1], [], []>} : vector<3x4xf32>, vector<4x256xf32>, vector<3x256xf32> -> vector<3x256xf32>
    %5 = vector.broadcast %1 : vector<3x1xf32> to vector<3x256xf32>
    %6 = arith.addf %4, %5 : vector<3x256xf32>
    %7 = arith.negf %6 : vector<3x256xf32>
    %8 = math.exp %7 : vector<3x256xf32>
    %cst_6 = arith.constant 1.000000e+00 : f32
    %9 = vector.broadcast %cst_6 : f32 to vector<3x256xf32>
    %10 = arith.addf %9, %8 : vector<3x256xf32>
    %11 = arith.divf %9, %10 : vector<3x256xf32>
    %c0_7 = arith.constant 0 : index
    %c0_8 = arith.constant 0 : index
    %c0_9 = arith.constant 0 : index
    %12 = vector.load %arg5[%c0_7, %c0_8, %c0_9] : memref<1x3x256xf32, #tpu.memory_space<vmem>>, vector<1x3x256xf32>
    %13 = vector.shape_cast %12 : vector<1x3x256xf32> to vector<3x256xf32>
    %14 = vector.shape_cast %11 : vector<3x256xf32> to vector<1x3x256xf32>
    tpu.vector_store %arg5[%c0_7, %c0_8, %c0_9], %14 {strides = array<i32>} : memref<1x3x256xf32, #tpu.memory_space<vmem>>, vector<1x3x256xf32>,
    return
  }
  func.func @transform_0(%arg0: i32, %arg1: i32) -> (i32, i32, i32) {
    %c0_i32 = arith.constant 0 : i32
    %c0_i32_0 = arith.constant 0 : i32
    return %arg0, %c0_i32, %arg1 : i32, i32, i32
  }
  func.func @transform_1(%arg0: i32, %arg1: i32) -> (i32, i32) {
    %c0_i32 = arith.constant 0 : i32
    %c0_i32_0 = arith.constant 0 : i32
    %c0_i32_1 = arith.constant 0 : i32
    return %c0_i32, %c0_i32_0 : i32, i32
  }
  func.func @transform_2(%arg0: i32, %arg1: i32) -> (i32, i32) {
    %c0_i32 = arith.constant 0 : i32
    %c0_i32_0 = arith.constant 0 : i32
    %c0_i32_1 = arith.constant 0 : i32
    return %c0_i32, %c0_i32_0 : i32, i32
  }
  func.func @transform_3(%arg0: i32, %arg1: i32) -> (i32, i32, i32) {
    %c0_i32 = arith.constant 0 : i32
    %c0_i32_0 = arith.constant 0 : i32
    return %arg0, %c0_i32, %arg1 : i32, i32, i32
  }
}

</mosaic_0001>

<bundles_post_ra>
// kernel: outconv_forward.1
= control target key start
LH: loop header
LB: loop body
LE: loop exit
PB: predicated region body
PF: predicated region fallthrough
CT: control target
= control target key end

     0   :  { %s504_s12 = smov 0   ;;  %s506_s13 = smov 0   ;;  %s546_s0 = inlined_call_operand.vmem [shape: f32[2,4,256], index: 0, kind: input, shape index: {}]   ;;  %s547_s1 = inlined_call_operand.vmem [shape: f32[3,4], index: 1, kind: input, shape index: {}]   ;;  %s548_s2 = inlined_call_operand.vmem [shape: f32[3,1], index: 2, kind: input, shape index: {}]   ;;  %s549_s3 = inlined_call_operand.vmem [shape: f32[2,3,256], index: 3, kind: output, shape index: {}]  }
   0x1   :  { %s508_s14 = smov 0  }
   0x2 LB: > { %s25_s15 = sadd.s32 1, %s476_s13  ;;  %p408_p0 = scmp.ge.s32.totalorder %s480_s14, 1  ;;  %s480_s14 = sphi %s508_s14, %s13_s14   ;;  %s476_s13 = sphi %s506_s13, %s551_s13   ;;  %s472_s12 = sphi %s504_s12, %s550_s12  }
   0x3   : > { %p27_p1 = scmp.ge.s32.totalorder %s25_s15, 2  ;;  %p158_p2 = scmp.lt.s32.totalorder %s480_s14, 3 }
   0x5   : > { %s553_s15 = smov (%p27_p1, %s25_s15), 0  ;;  %p159_p3 = pnand %p408_p0, %p158_p2 }
   0x6   : > { %p191_p4 = scmp.lt.s32.totalorder (!%p159_p3), %s472_s12, 1 }
   0x7   : > { %162 = sbr.rel (%p159_p3) target bundleno = 252 (0xfc), region = 32 }
   0xc   : > { %v482_v0 = vmov 0.0   ;;  %v211_v1 = vld [vmem:[%s548_s2] sm:$0x7]  ;;  %s555_s12 = smov (!%p191_p4, %s472_s12), 1  ;;  %v483_v2 = vmov 0   ;;  %vm224_vm0 = vcmask 1043456  }
   0xd   : > { %293 = vmatprep.mubr.f32.mxu0 %v482_v0  ;;  %448 = vset.pattern.permute.xlu0 %v483_v2  ;;  %s420_s18 = sshll.u32 %s555_s12, 3  ;;  %v210_v5 = vld [vmem:[%s547_s1] sm:$0x7]  ;;  %vm220_vm1 = vcmask 31744  }
   0xe   : > { %215 = vperm.xlu0 %448, %v211_v1   ;;  %s198_s21 = scalar_lea.vmem %s546_s0, %s420_s18  ;;  %s208_s26 = scalar_lea.vmem %s549_s3, %s420_s18 }
   0xf   : > { %v212_v3 = vld [vmem:[%s198_s21] sm:$0xff] }
  0x10   : > { %v219_v4 = vcombine.high %v212_v3, %v212_v3 }
  0x12   : > { %413 = vmatprep.subr.msk.mxu0 %vm224_vm0, %v219_v4 }
  0x13   : > { %414 = vmatpush1.msk.msra.mxu0 %vm224_vm0, %v212_v3 }
  0x14   : > { %415 = vmatmul.mubr.msk.f32.vlgmr.msra.gmra.mxu0 %vm220_vm1, %v210_v5 }
  0x89   : > { %v216_v6 = vpop.permute.xlu0 %215 }
  0xd4   : > { %v295_v7 = vpop.f32.mrf.mxu0 }
  0xd5   : > { %v296_v8 = vadd.f32 %v295_v7, %v216_v6 }
  0xd6   : > { %v297_v9 = vpop.f32.mrf.mxu0 }
  0xd7   : > { %v416_v10 = vmul.f32 -1.442695, %v296_v8  ;;  %v298_v11 = vadd.f32 %v297_v9, %v216_v6 }
  0xd9   : > { %450 = vpow2.f32 %v416_v10  ;;  %v417_v12 = vmul.f32 -1.442695, %v298_v11 }
  0xdb   : > { %452 = vpow2.f32 %v417_v12 }
  0xe6   : > { %v451_v13 = vpop.eup %450 }
  0xe7   : > { %v306_v14 = vadd.f32 1.0, %v451_v13 }
  0xe8   : > { %v453_v15 = vpop.eup %452 }
  0xe9   : > { %v307_v16 = vadd.f32 1.0, %v453_v15  ;;  %454 = vrcp.f32 %v306_v14 }
  0xeb   : > { %456 = vrcp.f32 %v307_v16 }
  0xf6   : > { %v455_v17 = vpop.eup %454 }
  0xf8   : > { %v457_v18 = vpop.eup %456 }
  0xf9   : > { %v314_v19 = vcombine.low %v455_v17, %v457_v18 }
  0xfb   : > { %316 = vst [vmem:[%s208_s26] sm:$0x77] %v314_v19 }
  0xfc PF: > { %s13_s14 = sadd.s32 1, %s480_s14   ;;  %s550_s12 = smov %s476_s13 }
  0xfd   : > { %p10_p5 = scmp.ge.s32.totalorder %s13_s14, 4   ;;  %s551_s13 = smov %s553_s15 }
  0xff   :  { %12 = sbr.rel (!%p10_p5) target bundleno = 2 (0x2), region = 62 }

</bundles_post_ra>
